<compile_context>
chip_gen: v7x
topology: tpu7x:2x2x1
jax: 0.10.0
libtpu: 0.0.40
codegen_flags: <defaults>
</compile_context>

<pallas_src>
import functools

import jax
import jax.numpy as jnp
from jax.experimental import pallas as pl
from jax.experimental.pallas import tpu as pltpu

P_DROP = 0.5
TARGET_BLOCK_BYTES = 2 << 20  # ~2 MiB per buffer; 3 operands x 2 bufs < 16 MiB VMEM


def _dropout_kernel(x_ref, bits_ref, o_ref, *, threshold, scale):
    # keep iff uniform uint32 bits >= threshold  =>  P(keep) = 1 - p
    keep = bits_ref[...] >= jnp.uint32(threshold)
    o_ref[...] = jnp.where(keep, x_ref[...] * scale,
                           jnp.zeros_like(x_ref[...])).astype(o_ref.dtype)


def dropout_pallas(x, key, p: float = P_DROP, training: bool = True):
    """Pallas TPU dropout matching nn.Dropout(p) in training mode."""
    if not training or p == 0.0:
        return x
    if p >= 1.0:
        return jnp.zeros_like(x)

    orig_shape = x.shape
    total = x.size

    # Pick a wide lane-dense last dim (largest multiple of 128 that divides total).
    lane = 128
    for cand in (4096, 2048, 1024, 512, 256, 128):
        if total % cand == 0:
            lane = cand
            break

    xf = x.reshape(-1)
    pad = (-total) % lane
    if pad:
        xf = jnp.pad(xf, (0, pad))
    rows = xf.size // lane
    x2d = xf.reshape(rows, lane)

    # Uniform uint32 bits for the whole tensor (padded elements get bits too;
    # they are sliced off afterwards).
    bits = jax.random.bits(key, (rows, lane), dtype=jnp.uint32)

    # Block sizing: ~TARGET_BLOCK_BYTES per buffer, sublane-aligned (multiple of 8),
    # or the full rows extent if the tensor is small.
    itemsize = jnp.dtype(x.dtype).itemsize
    target_rows = max(8, (TARGET_BLOCK_BYTES // (lane * itemsize)) // 8 * 8)
    if rows <= target_rows:
        block_rows = rows            # block equals full array extent -> always legal
    else:
        block_rows = target_rows     # multiple of 8; partial last block is masked

    grid = (pl.cdiv(rows, block_rows),)
    threshold = min(int(round(p * (1 << 32))), (1 << 32) - 1)
    scale = 1.0 / (1.0 - p)

    out2d = pl.pallas_call(
        functools.partial(_dropout_kernel, threshold=threshold, scale=scale),
        out_shape=jax.ShapeDtypeStruct((rows, lane), x.dtype),
        grid=grid,
        in_specs=[
            pl.BlockSpec((block_rows, lane), lambda i: (i, 0)),
            pl.BlockSpec((block_rows, lane), lambda i: (i, 0)),
        ],
        out_specs=pl.BlockSpec((block_rows, lane), lambda i: (i, 0)),
        compiler_params=pltpu.CompilerParams(
            dimension_semantics=("parallel",),  # independent blocks -> megacore OK
        ),
    )(x2d, bits)

    out = out2d.reshape(-1)
    if pad:
        out = out[:total]
    return out.reshape(orig_shape)


if __name__ == "__main__":
    root = jax.random.PRNGKey(0)
    data_key, mask_key = jax.random.split(root)

    # Small NCHW input consistent with a generic Dropout forward.
    x = jax.random.normal(data_key, (2, 4, 16, 16), dtype=jnp.float32)

    y = dropout_pallas(x, mask_key, p=P_DROP, training=True)
    y = jax.block_until_ready(y)

    # Sanity checks on dropout semantics: survivors are exactly x / (1 - p) = 2x,
    # dropped elements are exactly 0, and the drop fraction is near p.
    zero_mask = (y == 0.0)
    scaled_ok = jnp.allclose(jnp.where(zero_mask, 0.0, y),
                             jnp.where(zero_mask, 0.0, 2.0 * x),
                             rtol=1e-6, atol=1e-6)
    drop_frac = float(jnp.mean(zero_mask.astype(jnp.float32)))
    assert bool(scaled_ok), "surviving elements must equal x / (1 - p)"
    assert 0.3 < drop_frac < 0.7, f"drop fraction {drop_frac} far from p=0.5"

    # Eval-mode path is identity.
    y_eval = dropout_pallas(x, mask_key, p=P_DROP, training=False)
    assert jnp.array_equal(y_eval, x)

    print("KERNEL_OK")
</pallas_src>

<mosaic_0001>
module attributes {stable_mosaic.version = 11 : i64} {
  func.func @_dropout_kernel(%arg0: i32, %arg1: memref<1x2048xf32, #tpu.memory_space<vmem>>, %arg2: memref<1x2048xi32, #tpu.memory_space<vmem>>, %arg3: memref<1x2048xf32, #tpu.memory_space<vmem>>) attributes {dimension_semantics = [#tpu.dimension_semantics<parallel>], iteration_bounds = array<i64: 1>, scalar_prefetch = 0 : i64, scratch_operands = 0 : i64, tpu.core_type = #tpu.core_type<tc>, window_params = [{transform_indices = @transform_0, window_bounds = array<i64: 1, 2048>}, {transform_indices = @transform_1, window_bounds = array<i64: 1, 2048>}, {transform_indices = @transform_2, window_bounds = array<i64: 1, 2048>}]} {
    %c0 = arith.constant 0 : index
    %c0_0 = arith.constant 0 : index
    %0 = vector.load %arg2[%c0, %c0_0] : memref<1x2048xi32, #tpu.memory_space<vmem>>, vector<1x2048xi32>
    %c-2147483648_i32 = arith.constant -2147483648 : i32
    %1 = vector.broadcast %c-2147483648_i32 : i32 to vector<1x2048xi32>
    %2 = arith.cmpi uge, %0, %1 : vector<1x2048xi32>
    %c0_1 = arith.constant 0 : index
    %c0_2 = arith.constant 0 : index
    %3 = vector.load %arg1[%c0_1, %c0_2] : memref<1x2048xf32, #tpu.memory_space<vmem>>, vector<1x2048xf32>
    %cst = arith.constant 2.000000e+00 : f32
    %4 = vector.broadcast %cst : f32 to vector<1x2048xf32>
    %5 = arith.mulf %3, %4 : vector<1x2048xf32>
    %cst_3 = arith.constant 0.000000e+00 : f32
    %6 = vector.broadcast %cst_3 : f32 to vector<1x2048xf32>
    %7 = arith.select %2, %5, %6 : vector<1x2048xi1>, vector<1x2048xf32>
    %c0_4 = arith.constant 0 : index
    %c0_5 = arith.constant 0 : index
    %8 = vector.load %arg3[%c0_4, %c0_5] : memref<1x2048xf32, #tpu.memory_space<vmem>>, vector<1x2048xf32>
    tpu.vector_store %arg3[%c0_4, %c0_5], %7 {strides = array<i32>} : memref<1x2048xf32, #tpu.memory_space<vmem>>, vector<1x2048xf32>,
    return
  }
  func.func @transform_0(%arg0: i32) -> (i32, i32) {
    %c0_i32 = arith.constant 0 : i32
    %c0_i32_0 = arith.constant 0 : i32
    return %arg0, %c0_i32 : i32, i32
  }
  func.func @transform_1(%arg0: i32) -> (i32, i32) {
    %c0_i32 = arith.constant 0 : i32
    %c0_i32_0 = arith.constant 0 : i32
    return %arg0, %c0_i32 : i32, i32
  }
  func.func @transform_2(%arg0: i32) -> (i32, i32) {
    %c0_i32 = arith.constant 0 : i32
    %c0_i32_0 = arith.constant 0 : i32
    return %arg0, %c0_i32 : i32, i32
  }
}

</mosaic_0001>

<bundles_post_ra>
// kernel: tpu_custom_call.1
= control target key start
LH: loop header
LB: loop body
LE: loop exit
PB: predicated region body
PF: predicated region fallthrough
CT: control target
= control target key end

     0   :  { %7 = vsyncpa [#allocation3], 0  ;;  %s193_s0 = inlined_call_operand.hbm [shape: f32[1,2048], index: 0, kind: input, shape index: {}]   ;;  %s194_s1 = inlined_call_operand.hbm [shape: u32[1,2048], index: 1, kind: input, shape index: {}]   ;;  %s195_s2 = inlined_call_operand.hbm [shape: f32[1,2048], index: 2, kind: output, shape index: {}]  }
   0x1   :  { %8 = vsyncpa [#allocation6], 0 }
   0x2   :  { %9 = vsyncpa [#allocation4], 0  ;;  %s139_s9 = smov [#allocation2]   ;;  %s140_s11 = smov [#allocation5]  }
   0x3   :  { %s16_s10 = sshll.u32 %s139_s9, 4  ;;  %s26_s12 = sshll.u32 %s140_s11, 4  ;;  %s17_s10 = int_to_ptr.vmem [resolvable:$true] %s16_s10  ;;  %s27_s12 = int_to_ptr.vmem [resolvable:$true] %s26_s12 }
   0x4   :  { %s67_s15 = scalar_lea.hbm %s193_s0, 256 }
   0x5   :  { %p68_p0 = scmp.ne.s32.totalorder %s193_s0, %s67_s15  ;;  %p71_p1 = scmp.lt.u32.totalorder %s67_s15, %s193_s0 }
   0x7   :  { %p73_p2 = pnand %p71_p1, %p68_p0 }
   0x9   :  { %76 = shalt.err (!%p73_p2)
}
   0xa   :  { %s77_s20 = scalar_lea.vmem %s17_s10, 256  ;;  %p82_p4 = scmp.lt.s32.totalorder %s17_s10, %s17_s10 }
   0xb   :  { %p78_p3 = scmp.ne.s32.totalorder %s17_s10, %s77_s20  ;;  %p83_p5 = scmp.lt.s32.totalorder %s77_s20, %s77_s20 }
   0xd   :  { %p84_p6 = por %p83_p5, %p82_p4 }
   0xf   :  { %p85_p7 = pnand %p84_p6, %p78_p3 }
  0x11   :  { %88 = shalt.err (!%p85_p7)
}
  0x12   :  { %19 = dma.hbm_to_vmem [thread:$0]  %s193_s0, 256, %s17_s10, [#allocation3]  }
  0x13   :  { %s89_s25 = scalar_lea.hbm %s194_s1, 256 }
  0x14   :  { %p90_p8 = scmp.ne.s32.totalorder %s194_s1, %s89_s25  ;;  %p93_p9 = scmp.lt.u32.totalorder %s89_s25, %s194_s1 }
  0x16   :  { %p95_p10 = pnand %p93_p9, %p90_p8 }
  0x18   :  { %98 = shalt.err (!%p95_p10)
}
  0x19   :  { %s99_s30 = scalar_lea.vmem %s27_s12, 256  ;;  %p104_p12 = scmp.lt.s32.totalorder %s27_s12, %s27_s12 }
  0x1a   :  { %p100_p11 = scmp.ne.s32.totalorder %s27_s12, %s99_s30  ;;  %p105_p13 = scmp.lt.s32.totalorder %s99_s30, %s99_s30 }
  0x1c   :  { %p106_p0 = por %p105_p13, %p104_p12 }
  0x1e   :  { %p107_p1 = pnand %p106_p0, %p100_p11 }
  0x20   :  { %110 = shalt.err (!%p107_p1)
}
  0x21   :  { %29 = dma.hbm_to_vmem [thread:$0]  %s194_s1, 256, %s27_s12, [#allocation6]  }
  0x22   :  { %133 = dma.done.wait [#allocation3], 256  }
  0x23   :  { %134 = vsyncadd [#allocation3], 4294967040 }
  0x24   :  { %135 = dma.done.wait [#allocation6], 256  }
  0x25   :  { %136 = vsyncadd [#allocation6], 4294967040  ;;  %v36_v0 = vld [vmem:[#allocation5] sm:$0xff]  ;;  %v40_v1 = vld [vmem:[#allocation2] sm:$0xff]  ;;  %s141_s4 = smov [#allocation7]  }
  0x26   :  { %v37_v2 = vld [vmem:[#allocation5 + $0x8] sm:$0xff]  ;;  %s54_s5 = sshll.u32 %s141_s4, 4  ;;  %vm38_vm0 = vcmp.ge.u32.totalorder %v36_v0, 2147483648  ;;  %v42_v3 = vmul.f32 2.0, %v40_v1  ;;  %v41_v4 = vld [vmem:[#allocation2 + $0x8] sm:$0xff]  ;;  %s55_s5 = int_to_ptr.vmem [resolvable:$true] %s54_s5 }
  0x27   :  { %vm39_vm1 = vcmp.ge.u32.totalorder %v37_v2, 2147483648  ;;  %v43_v5 = vmul.f32 2.0, %v41_v4  ;;  %s111_s1 = scalar_lea.vmem %s55_s5, 256  ;;  %p116_p3 = scmp.lt.s32.totalorder %s55_s5, %s55_s5 }
  0x28   :  { %v44_v6 = vsel %vm38_vm0, %v42_v3, 0.0  ;;  %p112_p2 = scmp.ne.s32.totalorder %s55_s5, %s111_s1  ;;  %p117_p4 = scmp.lt.s32.totalorder %s111_s1, %s111_s1 }
  0x29   :  { %46 = vst [vmem:[#allocation7] sm:$0xff] %v44_v6  ;;  %v45_v7 = vsel %vm39_vm1, %v43_v5, 0.0 }
  0x2a   :  { %47 = vst [vmem:[#allocation7 + $0x8] sm:$0xff] %v45_v7  ;;  %p118_p5 = por %p117_p4, %p116_p3 }
  0x2c   :  { %p119_p6 = pnand %p118_p5, %p112_p2 }
  0x2e   :  { %122 = shalt.err (!%p119_p6)
}
  0x2f   :  { %s123_s8 = scalar_lea.hbm %s195_s2, 256 }
  0x30   :  { %p124_p7 = scmp.ne.s32.totalorder %s195_s2, %s123_s8  ;;  %p127_p8 = scmp.lt.u32.totalorder %s123_s8, %s195_s2 }
  0x32   :  { %p129_p9 = pnand %p127_p8, %p124_p7 }
  0x34   :  { %132 = shalt.err (!%p129_p9)
}
  0x35   :  { %57 = dma.vmem_to_hbm [thread:$0]  %s55_s5, 256, %s195_s2, [#allocation4]  }
  0x36   :  { %137 = dma.done.wait [#allocation4], 256  }
  0x37   :  { %138 = vsyncadd [#allocation4], 4294967040 }
  0x38   :  { %61 = vsyncpa [#allocation3], 1 }
  0x39   :  { %62 = vsyncpa [#allocation6], 1 }
  0x3a   :  { %63 = vsyncpa [#allocation4], 1 }

</bundles_post_ra>
